<compile_context>
chip_gen: v7x
topology: tpu7x:2x2x1
jax: 0.10.0
libtpu: 0.0.40
codegen_flags: <defaults>
</compile_context>

<pallas_src>
import jax
import jax.numpy as jnp
from jax.experimental import pallas as pl
from jax.experimental.pallas import tpu as pltpu

# ---- model hyperparameters (small, consistent with the module) ----
B = 2            # batch
N = 8            # sequence length (tokens)
DIM = 32         # embedding dim
HEADS = 4
DIM_HEAD = 16
INNER = HEADS * DIM_HEAD          # 64
BN = B * N                        # 16 tokens total
SCALE = DIM_HEAD ** (-0.5)        # 0.25 (power of two -> exact fold)
LN_EPS = 1e-5
NEG_INF = -1e30

# ---- tiling: BLK tokens per grid step (here the whole problem in one step) ----
BLK = BN                          # tokens per block (must hold whole sequences)
HB = HEADS * BLK                  # 64: rows of the block-diagonal K/V expansion

# ---- packed-parameter block layout (one grid-invariant DMA) ----
ROW_QKV_BIAS = 0                          # (1, 3*INNER)  beta @ w_qkv_scaled
ROW_BOUT = 1                              # (1, DIM)      output bias
ROW_WOUT = 8                              # (INNER, DIM)  output projection
ROW_HEADMASK = ROW_WOUT + INNER           # (HB, INNER)   0/1 head block mask
ROW_BATCHMASK = ROW_HEADMASK + HB         # (BLK, HB)     additive cross-batch mask
PARAM_ROWS = ROW_BATCHMASK + BLK          # 152 (multiple of 8)
PARAM_COLS = 3 * INNER                    # 192


def _attention_kernel(x_ref, wqkv_ref, p_ref, o_ref):
    """One grid step over BLK tokens.

    x_ref    : (BLK, DIM)               flattened input tokens
    wqkv_ref : (DIM, 3*INNER)           qkv weight (gamma + SCALE pre-folded)
    p_ref    : (PARAM_ROWS, PARAM_COLS) packed params (biases, w_out, masks)
    o_ref    : (BLK, DIM)               output tokens
    """
    x = x_ref[...]                                          # (BLK, DIM) f32

    # --- LayerNorm (normalize only; the affine is folded into wqkv / qkv bias) ---
    mean = jnp.mean(x, axis=-1, keepdims=True)
    xc = x - mean
    var = jnp.mean(xc * xc, axis=-1, keepdims=True)
    xhat = xc * jax.lax.rsqrt(var + LN_EPS)

    # --- fused QKV projection (MXU 1); gamma, beta and SCALE already folded ---
    qkv_bias = p_ref[ROW_QKV_BIAS:ROW_QKV_BIAS + 1, :]      # (1, 3*INNER)
    qkv = jnp.dot(xhat, wqkv_ref[...],
                  preferred_element_type=jnp.float32) + qkv_bias   # (BLK, 3*INNER)

    q = qkv[:, 0:INNER]                                     # (BLK, INNER), pre-scaled
    k = qkv[:, INNER:2 * INNER]                             # (BLK, INNER)
    v = qkv[:, 2 * INNER:3 * INNER]                         # (BLK, INNER)

    # --- constant masks (precomputed, DMA'd with the params) ---
    head_mask = p_ref[ROW_HEADMASK:ROW_HEADMASK + HB, 0:INNER]     # (HB, INNER) {0,1}
    batch_mask = p_ref[ROW_BATCHMASK:ROW_BATCHMASK + BLK, 0:HB]    # (BLK, HB) {0,-1e30}

    # --- block-diagonal K/V expansion: row h*BLK+s keeps only head h's columns ---
    k_bd = jnp.concatenate([k] * HEADS, axis=0) * head_mask        # (HB, INNER)
    v_bd = jnp.concatenate([v] * HEADS, axis=0) * head_mask        # (HB, INNER)

    # --- all heads' logits in ONE matmul (MXU 2): dots[t, h*BLK+s] = q_h(t).k_h(s) ---
    dots = jax.lax.dot_general(
        q, k_bd, dimension_numbers=(((1,), (1,)), ((), ())),
        preferred_element_type=jnp.float32)                        # (BLK, HB)
    dots = dots + batch_mask                                       # mask cross-batch keys

    # Softmax per 16-lane head segment.  Row-global max is exact for softmax
    # (same constant subtracted within each segment) and avoids segmented reduces.
    m = jnp.max(dots, axis=-1, keepdims=True)
    e = jnp.exp(dots - m)                                          # masked entries -> 0

    # Segment denominators via head_mask matmul (MXU 3): den[t, h*Dh+d] = sum_s e[t,h*BLK+s]
    den = jnp.dot(e, head_mask, preferred_element_type=jnp.float32)  # (BLK, INNER)
    # Head-concatenated unnormalized outputs (MXU 4).
    num = jnp.dot(e, v_bd, preferred_element_type=jnp.float32)       # (BLK, INNER)
    # One reciprocal over a dense block; approx=False keeps the 1e-4 check
    # (approx=True would be the EUP fast path at ~1e-3 relative error).
    out_cat = num * pl.reciprocal(den, approx=False)                 # (BLK, INNER)

    # --- fused output projection + bias (MXU 5) ---
    w_out = p_ref[ROW_WOUT:ROW_WOUT + INNER, 0:DIM]                  # (INNER, DIM)
    b_out = p_ref[ROW_BOUT:ROW_BOUT + 1, 0:DIM]                      # (1, DIM)
    o_ref[...] = jnp.dot(out_cat, w_out,
                         preferred_element_type=jnp.float32) + b_out


def fold_params(ln_g, ln_b, w_qkv, w_out, b_out):
    """One-time init transform: fold LN affine + softmax scale into the weights
    and pack all small parameters / constant masks into a single block."""
    # Fold the attention scale into the Q columns (exact: power of two).
    w_scaled = jnp.concatenate([w_qkv[:, :INNER] * SCALE, w_qkv[:, INNER:]], axis=-1)
    # Fold LayerNorm gamma into the weight rows; beta becomes a qkv bias.
    w_folded = ln_g.reshape(DIM, 1) * w_scaled                      # (DIM, 3*INNER)
    qkv_bias = ln_b.reshape(1, DIM) @ w_scaled                      # (1, 3*INNER)

    # Head-segment mask: M[h*BLK+s, h'*Dh+d] = 1 iff h == h'.
    row_h = jnp.arange(HB)[:, None] // BLK
    col_h = jnp.arange(INNER)[None, :] // DIM_HEAD
    head_mask = (row_h == col_h).astype(jnp.float32)                # (HB, INNER)

    # Cross-batch additive mask: token t may only attend to keys of its batch.
    t_b = jnp.arange(BLK)[:, None] // N
    s_b = (jnp.arange(HB)[None, :] % BLK) // N
    batch_mask = jnp.where(t_b == s_b, 0.0, NEG_INF).astype(jnp.float32)  # (BLK, HB)

    params = jnp.zeros((PARAM_ROWS, PARAM_COLS), jnp.float32)
    params = params.at[ROW_QKV_BIAS, :].set(qkv_bias[0])
    params = params.at[ROW_BOUT, :DIM].set(b_out.reshape(DIM))
    params = params.at[ROW_WOUT:ROW_WOUT + INNER, :DIM].set(w_out)
    params = params.at[ROW_HEADMASK:ROW_HEADMASK + HB, :INNER].set(head_mask)
    params = params.at[ROW_BATCHMASK:ROW_BATCHMASK + BLK, :HB].set(batch_mask)
    return w_folded, params


def attention_pallas(x, w_qkv_folded, params):
    """x: (B, N, DIM); w_qkv_folded/params from fold_params (one-time init)."""
    b, n, d = x.shape
    assert (b, n, d) == (B, N, DIM)
    x2 = x.reshape(b * n, d)                 # free contiguous HBM reshape
    assert x2.shape[0] % BLK == 0
    grid = (x2.shape[0] // BLK,)             # (1,) here; "parallel" shards row-blocks
                                             # across TCs on v7x once B*N grows.
    out = pl.pallas_call(
        _attention_kernel,
        out_shape=jax.ShapeDtypeStruct((x2.shape[0], DIM), jnp.float32),
        grid_spec=pltpu.PrefetchScalarGridSpec(
            num_scalar_prefetch=0,
            grid=grid,
            in_specs=[
                pl.BlockSpec((BLK, DIM), lambda i: (i, 0)),                 # tokens
                pl.BlockSpec((DIM, 3 * INNER), lambda i: (0, 0)),           # w_qkv (folded)
                pl.BlockSpec((PARAM_ROWS, PARAM_COLS), lambda i: (0, 0)),   # packed params
            ],
            out_specs=pl.BlockSpec((BLK, DIM), lambda i: (i, 0)),
        ),
        compiler_params=pltpu.CompilerParams(
            dimension_semantics=("parallel",)),
    )(x2, w_qkv_folded, params)
    return out.reshape(b, n, d)


def attention_reference(x, ln_g, ln_b, w_qkv, w_out, b_out):
    """Pure-JAX reference replicating the PyTorch forward (unfolded params)."""
    mean = jnp.mean(x, axis=-1, keepdims=True)
    var = jnp.mean((x - mean) ** 2, axis=-1, keepdims=True)
    xn = (x - mean) / jnp.sqrt(var + LN_EPS)
    xn = xn * ln_g[0] + ln_b[0]
    qkv = xn @ w_qkv                                              # (B, N, 3*INNER)
    q, k, v = jnp.split(qkv, 3, axis=-1)

    def split_heads(t):                                           # b n (h d) -> b h n d
        return t.reshape(t.shape[0], t.shape[1], HEADS, DIM_HEAD).transpose(0, 2, 1, 3)

    q, k, v = map(split_heads, (q, k, v))
    dots = jnp.einsum("bhnd,bhmd->bhnm", q, k) * SCALE
    attn = jax.nn.softmax(dots, axis=-1)
    out = jnp.einsum("bhnm,bhmd->bhnd", attn, v)
    out = out.transpose(0, 2, 1, 3).reshape(x.shape[0], x.shape[1], INNER)
    return out @ w_out + b_out[0]


if __name__ == "__main__":
    key = jax.random.PRNGKey(0)
    k_x, k_g, k_b, k_qkv, k_wo, k_bo = jax.random.split(key, 6)

    x = jax.random.normal(k_x, (B, N, DIM), dtype=jnp.float32)
    ln_g = 1.0 + 0.1 * jax.random.normal(k_g, (1, DIM), dtype=jnp.float32)
    ln_b = 0.1 * jax.random.normal(k_b, (1, DIM), dtype=jnp.float32)
    w_qkv = jax.random.normal(k_qkv, (DIM, 3 * INNER), dtype=jnp.float32) * (DIM ** -0.5)
    w_out = jax.random.normal(k_wo, (INNER, DIM), dtype=jnp.float32) * (INNER ** -0.5)
    b_out = 0.05 * jax.random.normal(k_bo, (1, DIM), dtype=jnp.float32)

    # One-time constant transform (parameter init / checkpoint load time).
    w_qkv_folded, params = fold_params(ln_g, ln_b, w_qkv, w_out, b_out)
    w_qkv_folded = jax.block_until_ready(w_qkv_folded)
    params = jax.block_until_ready(params)

    out = attention_pallas(x, w_qkv_folded, params)
    out = jax.block_until_ready(out)

    ref = attention_reference(x, ln_g, ln_b, w_qkv, w_out, b_out)
    assert out.shape == (B, N, DIM)
    assert jnp.allclose(out, ref, rtol=1e-4, atol=1e-4), (
        f"max abs err {jnp.max(jnp.abs(out - ref))}")

    print("KERNEL_OK")
</pallas_src>

<mosaic_0001>
module attributes {stable_mosaic.version = 11 : i64} {
  func.func @_attention_kernel(%arg0: i32, %arg1: memref<16x32xf32, #tpu.memory_space<vmem>>, %arg2: memref<32x192xf32, #tpu.memory_space<vmem>>, %arg3: memref<152x192xf32, #tpu.memory_space<vmem>>, %arg4: memref<16x32xf32, #tpu.memory_space<vmem>>) attributes {dimension_semantics = [#tpu.dimension_semantics<parallel>], iteration_bounds = array<i64: 1>, scalar_prefetch = 0 : i64, scratch_operands = 0 : i64, tpu.core_type = #tpu.core_type<tc>, window_params = [{transform_indices = @transform_0, window_bounds = array<i64: 16, 32>}, {pipeline_mode = #tpu.pipeline_mode<synchronous>, transform_indices = @transform_1, window_bounds = array<i64: 32, 192>}, {pipeline_mode = #tpu.pipeline_mode<synchronous>, transform_indices = @transform_2, window_bounds = array<i64: 152, 192>}, {transform_indices = @transform_3, window_bounds = array<i64: 16, 32>}]} {
    %c0 = arith.constant 0 : index
    %c0_0 = arith.constant 0 : index
    %0 = vector.load %arg1[%c0, %c0_0] : memref<16x32xf32, #tpu.memory_space<vmem>>, vector<16x32xf32>
    %cst = arith.constant dense<0.000000e+00> : vector<16xf32>
    %1 = vector.multi_reduction <add>, %0, %cst [1] : vector<16x32xf32> to vector<16xf32>
    %2 = vector.shape_cast %1 : vector<16xf32> to vector<16x1xf32>
    %cst_1 = arith.constant 3.200000e+01 : f32
    %3 = vector.broadcast %cst_1 : f32 to vector<16x1xf32>
    %4 = arith.divf %2, %3 : vector<16x1xf32>
    %5 = vector.broadcast %4 : vector<16x1xf32> to vector<16x32xf32>
    %6 = arith.subf %0, %5 : vector<16x32xf32>
    %7 = arith.mulf %6, %6 : vector<16x32xf32>
    %cst_2 = arith.constant dense<0.000000e+00> : vector<16xf32>
    %8 = vector.multi_reduction <add>, %7, %cst_2 [1] : vector<16x32xf32> to vector<16xf32>
    %9 = vector.shape_cast %8 : vector<16xf32> to vector<16x1xf32>
    %cst_3 = arith.constant 3.200000e+01 : f32
    %10 = vector.broadcast %cst_3 : f32 to vector<16x1xf32>
    %11 = arith.divf %9, %10 : vector<16x1xf32>
    %cst_4 = arith.constant 9.99999974E-6 : f32
    %12 = vector.broadcast %cst_4 : f32 to vector<16x1xf32>
    %13 = arith.addf %11, %12 : vector<16x1xf32>
    %14 = math.rsqrt %13 : vector<16x1xf32>
    %15 = vector.broadcast %14 : vector<16x1xf32> to vector<16x32xf32>
    %16 = arith.mulf %6, %15 : vector<16x32xf32>
    %c0_5 = arith.constant 0 : index
    %c0_6 = arith.constant 0 : index
    %17 = vector.load %arg3[%c0_5, %c0_6] : memref<152x192xf32, #tpu.memory_space<vmem>>, vector<1x192xf32>
    %c0_7 = arith.constant 0 : index
    %c0_8 = arith.constant 0 : index
    %18 = vector.load %arg2[%c0_7, %c0_8] : memref<32x192xf32, #tpu.memory_space<vmem>>, vector<32x192xf32>
    %cst_9 = arith.constant dense<0.000000e+00> : vector<16x192xf32>
    %19 = tpu.matmul %16, %18, %cst_9 {dimension_numbers = #tpu.dot_dimension_numbers<[1], [0], [0], [1], [0, 0, 1, 1], [], []>} : vector<16x32xf32>, vector<32x192xf32>, vector<16x192xf32> -> vector<16x192xf32>
    %20 = vector.broadcast %17 : vector<1x192xf32> to vector<16x192xf32>
    %21 = arith.addf %19, %20 : vector<16x192xf32>
    %22 = vector.extract_strided_slice %21 {offsets = [0, 0], sizes = [16, 64], strides = [1, 1]} : vector<16x192xf32> to vector<16x64xf32>
    %23 = vector.extract_strided_slice %21 {offsets = [0, 64], sizes = [16, 64], strides = [1, 1]} : vector<16x192xf32> to vector<16x64xf32>
    %24 = vector.extract_strided_slice %21 {offsets = [0, 128], sizes = [16, 64], strides = [1, 1]} : vector<16x192xf32> to vector<16x64xf32>
    %c72 = arith.constant 72 : index
    %c0_10 = arith.constant 0 : index
    %25 = vector.load %arg3[%c72, %c0_10] : memref<152x192xf32, #tpu.memory_space<vmem>>, vector<64x64xf32>
    %c136 = arith.constant 136 : index
    %c0_11 = arith.constant 0 : index
    %26 = vector.load %arg3[%c136, %c0_11] : memref<152x192xf32, #tpu.memory_space<vmem>>, vector<16x64xf32>
    %27 = tpu.concatenate %23, %23, %23, %23 in 0 : vector<16x64xf32>, vector<16x64xf32>, vector<16x64xf32>, vector<16x64xf32> -> vector<64x64xf32>
    %28 = arith.mulf %27, %25 : vector<64x64xf32>
    %29 = tpu.concatenate %24, %24, %24, %24 in 0 : vector<16x64xf32>, vector<16x64xf32>, vector<16x64xf32>, vector<16x64xf32> -> vector<64x64xf32>
    %30 = arith.mulf %29, %25 : vector<64x64xf32>
    %cst_12 = arith.constant dense<0.000000e+00> : vector<16x64xf32>
    %31 = tpu.matmul %22, %28, %cst_12 {dimension_numbers = #tpu.dot_dimension_numbers<[1], [1], [0], [0], [0, 0, 1, 0], [], []>} : vector<16x64xf32>, vector<64x64xf32>, vector<16x64xf32> -> vector<16x64xf32>
    %32 = arith.addf %31, %26 : vector<16x64xf32>
    %cst_13 = arith.constant dense<0xFF800000> : vector<16xf32>
    %33 = vector.multi_reduction <maximumf>, %32, %cst_13 [1] : vector<16x64xf32> to vector<16xf32>
    %34 = vector.shape_cast %33 : vector<16xf32> to vector<16x1xf32>
    %35 = vector.broadcast %34 : vector<16x1xf32> to vector<16x64xf32>
    %36 = arith.subf %32, %35 : vector<16x64xf32>
    %37 = math.exp %36 : vector<16x64xf32>
    %cst_14 = arith.constant dense<0.000000e+00> : vector<16x64xf32>
    %38 = tpu.matmul %37, %25, %cst_14 {dimension_numbers = #tpu.dot_dimension_numbers<[1], [0], [0], [1], [0, 0, 1, 1], [], []>} : vector<16x64xf32>, vector<64x64xf32>, vector<16x64xf32> -> vector<16x64xf32>
    %cst_15 = arith.constant dense<0.000000e+00> : vector<16x64xf32>
    %39 = tpu.matmul %37, %30, %cst_15 {dimension_numbers = #tpu.dot_dimension_numbers<[1], [0], [0], [1], [0, 0, 1, 1], [], []>} : vector<16x64xf32>, vector<64x64xf32>, vector<16x64xf32> -> vector<16x64xf32>
    %40 = tpu.reciprocal %38 : vector<16x64xf32> -> vector<16x64xf32>
    %41 = arith.mulf %39, %40 : vector<16x64xf32>
    %c8 = arith.constant 8 : index
    %c0_16 = arith.constant 0 : index
    %42 = vector.load %arg3[%c8, %c0_16] : memref<152x192xf32, #tpu.memory_space<vmem>>, vector<64x32xf32>
    %c1 = arith.constant 1 : index
    %c0_17 = arith.constant 0 : index
    %43 = vector.load %arg3[%c1, %c0_17] : memref<152x192xf32, #tpu.memory_space<vmem>>, vector<1x32xf32>
    %cst_18 = arith.constant dense<0.000000e+00> : vector<16x32xf32>
    %44 = tpu.matmul %41, %42, %cst_18 {dimension_numbers = #tpu.dot_dimension_numbers<[1], [0], [0], [1], [0, 0, 1, 1], [], []>} : vector<16x64xf32>, vector<64x32xf32>, vector<16x32xf32> -> vector<16x32xf32>
    %45 = vector.broadcast %43 : vector<1x32xf32> to vector<16x32xf32>
    %46 = arith.addf %44, %45 : vector<16x32xf32>
    %c0_19 = arith.constant 0 : index
    %c0_20 = arith.constant 0 : index
    %47 = vector.load %arg4[%c0_19, %c0_20] : memref<16x32xf32, #tpu.memory_space<vmem>>, vector<16x32xf32>
    tpu.vector_store %arg4[%c0_19, %c0_20], %46 {strides = array<i32>} : memref<16x32xf32, #tpu.memory_space<vmem>>, vector<16x32xf32>,
    return
  }
  func.func @transform_0(%arg0: i32) -> (i32, i32) {
    %c0_i32 = arith.constant 0 : i32
    %c0_i32_0 = arith.constant 0 : i32
    return %arg0, %c0_i32 : i32, i32
  }
  func.func @transform_1(%arg0: i32) -> (i32, i32) {
    %c0_i32 = arith.constant 0 : i32
    %c0_i32_0 = arith.constant 0 : i32
    %c0_i32_1 = arith.constant 0 : i32
    return %c0_i32, %c0_i32_0 : i32, i32
  }
  func.func @transform_2(%arg0: i32) -> (i32, i32) {
    %c0_i32 = arith.constant 0 : i32
    %c0_i32_0 = arith.constant 0 : i32
    %c0_i32_1 = arith.constant 0 : i32
    return %c0_i32, %c0_i32_0 : i32, i32
  }
  func.func @transform_3(%arg0: i32) -> (i32, i32) {
    %c0_i32 = arith.constant 0 : i32
    %c0_i32_0 = arith.constant 0 : i32
    return %arg0, %c0_i32 : i32, i32
  }
}

</mosaic_0001>

<bundles_post_ra>
// kernel: tpu_custom_call.1
= control target key start
LH: loop header
LB: loop body
LE: loop exit
PB: predicated region body
PF: predicated region fallthrough
CT: control target
= control target key end

     0   :  { %8 = vsyncpa [#allocation3], 0  ;;  %s1191_s0 = inlined_call_operand.hbm [shape: f32[16,32], index: 0, kind: input, shape index: {}]   ;;  %s1192_s1 = inlined_call_operand.hbm [shape: f32[32,192], index: 1, kind: input, shape index: {}]   ;;  %s1193_s2 = inlined_call_operand.hbm [shape: f32[152,192], index: 2, kind: input, shape index: {}]   ;;  %s1194_s3 = inlined_call_operand.hbm [shape: f32[16,32], index: 3, kind: output, shape index: {}]  }
   0x1   :  { %9 = vsyncpa [#allocation6], 0 }
   0x2   :  { %10 = vsyncpa [#allocation4], 0  ;;  %s1001_s12 = smov [#allocation5]   ;;  %s907_s16 = scalar_lea.hbm %s1192_s1, 1024 }
   0x3   :  { %s28_s13 = sshll.u32 %s1001_s12, 4  ;;  %p908_p0 = scmp.ne.s32.totalorder %s1192_s1, %s907_s16  ;;  %s29_s13 = int_to_ptr.vmem [resolvable:$true] %s28_s13 }
   0x4   :  { %p911_p1 = scmp.lt.u32.totalorder %s907_s16, %s1192_s1 }
   0x6   :  { %p913_p2 = pnand %p911_p1, %p908_p0 }
   0x8   :  { %916 = shalt.err (!%p913_p2)
}
   0x9   :  { %s917_s21 = scalar_lea.vmem %s29_s13, 1024  ;;  %p922_p4 = scmp.lt.s32.totalorder %s29_s13, %s29_s13 }
   0xa   :  { %p918_p3 = scmp.ne.s32.totalorder %s29_s13, %s917_s21  ;;  %p923_p5 = scmp.lt.s32.totalorder %s917_s21, %s917_s21 }
   0xc   :  { %p924_p6 = por %p923_p5, %p922_p4 }
   0xe   :  { %p925_p7 = pnand %p924_p6, %p918_p3 }
  0x10   :  { %928 = shalt.err (!%p925_p7)
}
  0x11   :  { %s1002_s22 = smov 256   ;;  %s1003_s23 = smov 16  }
  0x12   :  { %34 = dma.hbm_to_vmem [thread:$0]  %s1192_s1, 1024, %s29_s13, [#allocation6], %s1002_s22, %s1002_s22, %s1003_s23  }
  0x13   :  { %s1004_s26 = smov [#allocation2]   ;;  %s929_s30 = scalar_lea.hbm %s1191_s0, 256 }
  0x14   :  { %s16_s27 = sshll.u32 %s1004_s26, 4  ;;  %p930_p8 = scmp.ne.s32.totalorder %s1191_s0, %s929_s30  ;;  %s17_s27 = int_to_ptr.vmem [resolvable:$true] %s16_s27 }
  0x15   :  { %p933_p9 = scmp.lt.u32.totalorder %s929_s30, %s1191_s0 }
  0x17   :  { %p935_p10 = pnand %p933_p9, %p930_p8 }
  0x19   :  { %938 = shalt.err (!%p935_p10)
}
  0x1a   :  { %s939_s8 = scalar_lea.vmem %s17_s27, 256  ;;  %p944_p12 = scmp.lt.s32.totalorder %s17_s27, %s17_s27 }
  0x1b   :  { %p940_p11 = scmp.ne.s32.totalorder %s17_s27, %s939_s8  ;;  %p945_p13 = scmp.lt.s32.totalorder %s939_s8, %s939_s8 }
  0x1d   :  { %p946_p0 = por %p945_p13, %p944_p12 }
  0x1f   :  { %p947_p1 = pnand %p946_p0, %p940_p11 }
  0x21   :  { %950 = shalt.err (!%p947_p1)
}
  0x22   :  { %s1005_s1 = smov 128   ;;  %s1006_s9 = smov 8  }
  0x23   :  { %22 = dma.hbm_to_vmem [thread:$0]  %s1191_s0, 256, %s17_s27, [#allocation3], %s1005_s1, %s1005_s1, %s1006_s9  }
  0x24   :  { %s1007_s12 = smov [#allocation7]   ;;  %s951_s16 = scalar_lea.hbm %s1193_s2, 4864 }
  0x25   :  { %s40_s13 = sshll.u32 %s1007_s12, 4  ;;  %p952_p2 = scmp.ne.s32.totalorder %s1193_s2, %s951_s16  ;;  %s41_s13 = int_to_ptr.vmem [resolvable:$true] %s40_s13 }
  0x26   :  { %p955_p3 = scmp.lt.u32.totalorder %s951_s16, %s1193_s2 }
  0x28   :  { %p957_p4 = pnand %p955_p3, %p952_p2 }
  0x2a   :  { %960 = shalt.err (!%p957_p4)
}
  0x2b   :  { %s961_s21 = scalar_lea.vmem %s41_s13, 4864  ;;  %p966_p6 = scmp.lt.s32.totalorder %s41_s13, %s41_s13 }
  0x2c   :  { %p962_p5 = scmp.ne.s32.totalorder %s41_s13, %s961_s21  ;;  %p967_p7 = scmp.lt.s32.totalorder %s961_s21, %s961_s21 }
  0x2e   :  { %p968_p8 = por %p967_p7, %p966_p6 }
  0x30   :  { %p969_p9 = pnand %p968_p8, %p962_p5 }
  0x32   :  { %972 = shalt.err (!%p969_p9)
}
  0x33   :  { %46 = dma.hbm_to_vmem [thread:$0]  %s1193_s2, 4864, %s41_s13, [#allocation6], %s1002_s22, %s1002_s22, %s1003_s23  }
  0x34   :  { %995 = dma.done.wait [#allocation3], 256  }
  0x35   :  { %996 = vsyncadd [#allocation3], 4294967040 }
  0x36   :  { %997 = dma.done.wait [#allocation6], 5888  }
  0x37   :  { %998 = vsyncadd [#allocation6], 4294961408  ;;  %vm58_vm0 = vcmask 261120   ;;  %v56_v0 = vld [vmem:[#allocation2] sm:$0xff]  ;;  %v57_v1 = vld [vmem:[#allocation2 + $0x8] sm:$0xff]  ;;  %v1008_v25 = vmov 0.0   ;;  %v96_v50 = vlaneseq }
  0x38   :  { %v59_v2 = vsel %vm58_vm0, %v56_v0, 0.0  ;;  %v62_v3 = vsel %vm58_vm0, %v57_v1, 0.0  ;;  %v88_v14 = vld [vmem:[#allocation5 + $0x8] sm:$0xff]  ;;  %v90_v15 = vld [vmem:[#allocation5 + $0x18] sm:$0xff]  ;;  %v87_v17 = vld [vmem:[#allocation5] sm:$0xff]  ;;  %176 = vmatprep.mubr.f32.mxu0 %v1008_v25  ;;  %s1009_s2 = smov 64  }
  0x39   :  { %60 = vadd.xlane.f32.xlu0 %v59_v2  ;;  %v785_v16 = vpack.c.bf16 %v90_v15, %v88_v14  ;;  %v89_v18 = vld [vmem:[#allocation5 + $0x10] sm:$0xff]  ;;  %v92_v20 = vld [vmem:[#allocation5 + $0x28] sm:$0xff]  ;;  %v94_v21 = vld [vmem:[#allocation5 + $0x38] sm:$0xff]  ;;  %v97_v52 = vshrl.u32 %v96_v50, 7  ;;  %vm271_vm1 = vcmask 523264   ;;  %s1010_s22 = smov [#allocation8]  }
  0x3a   :  { %v787_v19 = vpack.c.bf16 %v89_v18, %v87_v17  ;;  %v91_v22 = vld [vmem:[#allocation5 + $0x20] sm:$0xff]  ;;  %v789_v23 = vpack.c.bf16 %v94_v21, %v92_v20  ;;  %v93_v24 = vld [vmem:[#allocation5 + $0x30] sm:$0xff]  ;;  %vm1141_vm2 = vmpackc.low %vm271_vm1, %vm271_vm1  ;;  %s638_s23 = sshll.u32 %s1010_s22, 4  ;;  %s639_s23 = int_to_ptr.vmem [resolvable:$true] %s638_s23 }
  0x3b   :  { %786 = vmatprep.subr.bf16.mxu0 %v785_v16  ;;  %v791_v26 = vpack.c.bf16 %v93_v24, %v91_v22  ;;  %v1080_v27 = vld [vmem:[#allocation7 + $0xa0] sm:$0xff]  ;;  %v1082_v28 = vld [vmem:[#allocation7 + $0x90] sm:$0xff]  ;;  %v98_v53 = vsub.s32 0, %v97_v52  ;;  %v102_v56 = vsub.s32 1, %v97_v52  ;;  %s973_s25 = scalar_lea.vmem %s639_s23, 256  ;;  %p978_p11 = scmp.lt.s32.totalorder %s639_s23, %s639_s23 }
  0x3c   :  { %788 = vmatpush1.bf16.msra.mxu0 %v787_v19  ;;  %v817_v29 = vpack.c.bf16 %v1080_v27, %v1082_v28  ;;  %v1090_v30 = vld [vmem:[#allocation7 + $0xb0] sm:$0xff]  ;;  %v1098_v32 = vld [vmem:[#allocation7 + $0xc0] sm:$0xff]  ;;  %p974_p10 = scmp.ne.s32.totalorder %s639_s23, %s973_s25  ;;  %p979_p12 = scmp.lt.s32.totalorder %s973_s25, %s973_s25 }
  0x3d   :  { %63 = vadd.xlane.f32.xlu0 %v62_v3  ;;  %790 = vmatprep.subr.bf16.mxu0 %v789_v23  ;;  %v1092_v31 = vld [vmem:[#allocation7 + $0xd0] sm:$0xff]  ;;  %v1106_v34 = vld [vmem:[#allocation7 + $0xe0] sm:$0xff]  ;;  %v821_v46 = vpack.c.bf16 %v1098_v32, %v1090_v30 }
  0x3e   :  { %v1100_v33 = vld [vmem:[#allocation7 + $0xf0] sm:$0xff]  ;;  %v1110_v35 = vld [vmem:[#allocation7 + $0x100] sm:$0xff]  ;;  %v825_v47 = vpack.c.bf16 %v1106_v34, %v1092_v31  ;;  %p980_p13 = por %p979_p12, %p978_p11 }
  0x3f   :  { %v829_v48 = vpack.c.bf16 %v1110_v35, %v1100_v33  ;;  %v86_v55 = vld [vmem:[#allocation7] ss:$8 sm:$0x3]  ;;  %v197_v50 = vld [vmem:[#allocation7 + $0x110] sm:$0xff] }
  0x40   :  { %792 = vmatpush1.bf16.msra.mxu0 %v791_v26  ;;  %v99_v58 = vrot.slane %v86_v55, %v98_v53  ;;  %v103_v59 = vrot.slane %v86_v55, %v102_v56  ;;  %p981_p0 = pnand %p980_p13, %p974_p10 }
  0x41   :  { %818 = vmatprep.subr.bf16.mxu0 %v817_v29 }
  0x53   :  { %207 = vrot.lane.b32.xlu0 %v1082_v28, %s1009_s2 }
  0x57   :  { %215 = vrot.lane.b32.xlu0 %v1092_v31, %s1009_s2 }
  0x5b   :  { %219 = vrot.lane.b32.xlu0 %v1100_v33, %s1009_s2 }
  0xc6   :  { %v61_v4 = vpop.xlane.xlu0 %60 }
  0xc7   :  { %v66_v5 = vmul.f32 0.03125, %v61_v4 }
  0xc9   :  { %v68_v6 = vsub.f32 %v56_v0, %v66_v5 }
  0xca   :  { %v64_v7 = vpop.xlane.xlu0 %63 }
  0xcb   :  { %v67_v8 = vmul.f32 0.03125, %v64_v7  ;;  %v70_v9 = vmul.f32 %v68_v6, %v68_v6 }
  0xcd   :  { %v69_v10 = vsub.f32 %v57_v1, %v67_v8  ;;  %v72_v11 = vsel %vm58_vm0, %v70_v9, 0.0 }
  0xce   :  { %73 = vadd.xlane.f32.xlu1 %v72_v11  ;;  %v208_v57 = vpop.permute.xlu0 %207 }
  0xcf   :  { %v71_v12 = vmul.f32 %v69_v10, %v69_v10 }
  0xd1   :  { %v75_v13 = vsel %vm58_vm0, %v71_v12, 0.0 }
  0xd2   :  { %76 = vadd.xlane.f32.xlu1 %v75_v13  ;;  %v216_v0 = vpop.permute.xlu0 %215 }
  0xd6   :  { %v220_v15 = vpop.permute.xlu0 %219 }
  0xe3   :  { %209 = vrot.lane.b32.xlu1 %v1080_v27, %s1009_s2 }
  0xe7   :  { %211 = vrot.lane.b32.xlu1 %v1090_v30, %s1009_s2 }
  0xeb   :  { %213 = vrot.lane.b32.xlu1 %v1098_v32, %s1009_s2 }
  0xef   :  { %217 = vrot.lane.b32.xlu1 %v1106_v34, %s1009_s2 }
  0xf3   :  { %221 = vrot.lane.b32.xlu1 %v1110_v35, %s1009_s2 }
 0x15b   :  { %v74_v36 = vpop.xlane.xlu1 %73 }
 0x15c   :  { %v78_v37 = vmul.f32 0.03125, %v74_v36 }
 0x15e   :  { %v80_v38 = vadd.f32 1e-05, %v78_v37 }
 0x15f   :  { %v77_v39 = vpop.xlane.xlu1 %76 }
 0x160   :  { %895 = vrsqrt.f32 %v80_v38  ;;  %v79_v40 = vmul.f32 0.03125, %v77_v39 }
 0x162   :  { %v81_v41 = vadd.f32 1e-05, %v79_v40 }
 0x163   :  { %v210_v49 = vpop.permute.xlu1 %209 }
 0x164   :  { %897 = vrsqrt.f32 %v81_v41 }
 0x167   :  { %v212_v51 = vpop.permute.xlu1 %211 }
 0x16a   :  { %v896_v42 = vpop.eup %895 }
 0x16b   :  { %v84_v43 = vmul.f32 %v896_v42, %v68_v6  ;;  %v214_v54 = vpop.permute.xlu1 %213 }
 0x16d   :  { %651 = vmatmul.mubr.msk.f32.vlgmr.msra.gmra.mrb[0].mxu0 %vm58_vm0, %v84_v43 }
 0x16e   :  { %v898_v44 = vpop.eup %897  ;;  %182 = vmatprep.mubr.f32.mxu0 %v1008_v25  ;;  %820 = vmatpush3.bf16.msra.mxu0 %v817_v29 }
 0x16f   :  { %v85_v45 = vmul.f32 %v898_v44, %v69_v10  ;;  %822 = vmatprep.subr.bf16.mxu0 %v821_v46  ;;  %v218_v61 = vpop.permute.xlu1 %217 }
 0x171   :  { %652 = vmatmul.mubr.msk.f32.gmra.mrb[2].mxu0 %vm58_vm0, %v85_v45 }
 0x172   :  { %824 = vmatpush3.bf16.msra.mxu0 %v821_v46 }
 0x173   :  { %826 = vmatprep.subr.bf16.mxu0 %v825_v47  ;;  %v222_v7 = vpop.permute.xlu1 %221 }
 0x176   :  { %828 = vmatpush3.bf16.msra.mxu0 %v825_v47 }
 0x177   :  { %830 = vmatprep.subr.bf16.mxu0 %v829_v48 }
 0x17a   :  { %832 = vmatpush3.bf16.msra.mxu0 %v829_v48 }
 0x240   :  { %v178_v60 = vpop.f32.mrb[0].mxu0 }
 0x241   :  { %v179_v62 = vadd.f32 %v178_v60, %v99_v58  ;;  %v180_v63 = vpop.f32.mrb[1].mxu0 }
 0x242   :  { %v181_v1 = vadd.f32 %v180_v63, %v103_v59 }
 0x243   :  { %725 = vmatprep.mubr.msk.f32.mxu1 %vm271_vm1, %v179_v62  ;;  %v233_v5 = vmul.f32 %v212_v51, %v179_v62  ;;  %v231_v8 = vmul.f32 %v208_v57, %v179_v62  ;;  %v237_v29 = vmul.f32 %v220_v15, %v179_v62 }
 0x244   :  { %v184_v2 = vpop.f32.mrb[2].mxu0  ;;  %v239_v9 = vmul.f32 %v1082_v28, %v181_v1  ;;  %v241_v10 = vmul.f32 %v1090_v30, %v181_v1  ;;  %v243_v13 = vmul.f32 %v1092_v31, %v181_v1  ;;  %v245_v14 = vmul.f32 %v1100_v33, %v181_v1  ;;  %v541_v1 = vld [vmem:[#allocation7 + $0x10] sm:$0xff] }
 0x245   :  { %v185_v3 = vadd.f32 %v184_v2, %v99_v58  ;;  %v186_v4 = vpop.f32.mrb[3].mxu0  ;;  %v542_v2 = vld [vmem:[#allocation7 + $0x20] sm:$0xff] }
 0x246   :  { %v187_v6 = vadd.f32 %v186_v4, %v103_v59  ;;  %v849_v4 = vpack.c.bf16 %v542_v2, %v541_v1 }
 0x247   :  { %v234_v11 = vmul.f32 %v214_v54, %v185_v3  ;;  %v232_v12 = vmul.f32 %v210_v49, %v185_v3  ;;  %v238_v20 = vmul.f32 %v222_v7, %v185_v3  ;;  %v236_v23 = vmul.f32 %v218_v61, %v185_v3  ;;  %v198_v49 = vld [vmem:[#allocation7 + $0x120] sm:$0xff]  ;;  %v545_v7 = vld [vmem:[#allocation7 + $0x50] sm:$0xff] }
 0x248   :  { %v240_v16 = vmul.f32 %v1080_v27, %v187_v6  ;;  %v242_v17 = vmul.f32 %v1098_v32, %v187_v6  ;;  %v244_v18 = vmul.f32 %v1106_v34, %v187_v6  ;;  %v246_v19 = vmul.f32 %v1110_v35, %v187_v6 }
 0x249   :  { %v880_v21 = vpack.i.bf16 %v234_v11, %v233_v5  ;;  %v875_v22 = vpack.i.bf16 %v232_v12, %v231_v8  ;;  %v235_v27 = vmul.f32 %v216_v0, %v179_v62  ;;  %v890_v30 = vpack.i.bf16 %v238_v20, %v237_v29  ;;  %v544_v5 = vld [vmem:[#allocation7 + $0x40] sm:$0xff] }
 0x24a   :  { %v833_v24 = vpack.c.bf16 %v240_v16, %v239_v9  ;;  %v837_v25 = vpack.c.bf16 %v242_v17, %v241_v10  ;;  %v1131_v26 = vpack.c.bf16 %v244_v18, %v243_v13  ;;  %v1133_v28 = vpack.c.bf16 %v246_v19, %v245_v14  ;;  %v546_v8 = vld [vmem:[#allocation7 + $0x60] sm:$0xff]  ;;  %v547_v10 = vld [vmem:[#allocation7 + $0x70] sm:$0xff] }
 0x24b   :  { %881 = vrot.lane.b32.xlu1 %v880_v21, %s1009_s2  ;;  %876 = vrot.lane.b32.xlu0 %v875_v22, %s1009_s2  ;;  %v885_v31 = vpack.i.bf16 %v236_v23, %v235_v27  ;;  %v857_v9 = vpack.c.bf16 %v546_v8, %v545_v7  ;;  %v548_v11 = vld [vmem:[#allocation7 + $0x80] sm:$0xff] }
 0x24c   :  { %834 = vmatprep.subr.bf16.mxu0 %v833_v24  ;;  %v861_v12 = vpack.c.bf16 %v548_v11, %v547_v10  ;;  %v549_v21 = vld [vmem:[#allocation7 + $0x1] ss:$0 sm:$0xff] }
 0x24f   :  { %886 = vrot.lane.b32.xlu0 %v885_v31, %s1009_s2  ;;  %891 = vrot.lane.b32.xlu1 %v890_v30, %s1009_s2 }
 0x2bd   :  { %v882_v32 = vpop.permute.xlu1 %881  ;;  %v877_v33 = vpop.permute.xlu0 %876 }
 0x2be   :  { %v884_v34 = vunpack.i.h.bf16 %v882_v32  ;;  %v883_v35 = vunpack.i.l.bf16 %v882_v32  ;;  %v879_v36 = vunpack.i.h.bf16 %v877_v33  ;;  %v878_v37 = vunpack.i.l.bf16 %v877_v33 }
 0x2c0   :  { %v793_v39 = vpack.c.bf16 %v879_v36, %v878_v37  ;;  %v799_v40 = vpack.c.bf16 %v884_v34, %v883_v35 }
 0x2c1   :  { %v887_v41 = vpop.permute.xlu0 %886  ;;  %v892_v45 = vpop.permute.xlu1 %891 }
 0x2c2   :  { %795 = vmatprep.subr.msk.bf16.mxu1 %vm1141_vm2, %v793_v39  ;;  %v889_v42 = vunpack.i.h.bf16 %v887_v41  ;;  %v888_v43 = vunpack.i.l.bf16 %v887_v41  ;;  %v894_v46 = vunpack.i.h.bf16 %v892_v45  ;;  %v893_v47 = vunpack.i.l.bf16 %v892_v45 }
 0x2c3   :  { %798 = vmatpush3.bf16.xpose.msk.msra.mxu1 %vm1141_vm2, %v793_v39 }
 0x2c4   :  { %801 = vmatprep.subr.msk.bf16.mxu1 %vm1141_vm2, %v799_v40  ;;  %v805_v44 = vpack.c.bf16 %v889_v42, %v888_v43  ;;  %v811_v48 = vpack.c.bf16 %v894_v46, %v893_v47 }
 0x2cb   :  { %804 = vmatpush3.bf16.xpose.msk.msra.mxu1 %vm1141_vm2, %v799_v40 }
 0x2cc   :  { %807 = vmatprep.subr.msk.bf16.mxu1 %vm1141_vm2, %v805_v44 }
 0x2d3   :  { %810 = vmatpush3.bf16.xpose.msk.msra.mxu1 %vm1141_vm2, %v805_v44 }
 0x2d4   :  { %813 = vmatprep.subr.msk.bf16.mxu1 %vm1141_vm2, %v811_v48 }
 0x2db   :  { %816 = vmatpush3.bf16.xpose.msk.msra.mxu1 %vm1141_vm2, %v811_v48 }
 0x2dc   :  { %850 = vmatprep.subr.bf16.mxu1 %v849_v4 }
 0x2e2   :  { %726 = vmatmul.mubr.msk.f32.vlgmr.msra.gmra.mrb[0].mxu1 %vm271_vm1, %v185_v3  ;;  %v543_v3 = vld [vmem:[#allocation7 + $0x30] sm:$0xff] }
 0x2e3   :  { %v853_v6 = vpack.c.bf16 %v544_v5, %v543_v3  ;;  %852 = vmatpush3.bf16.msra.mxu1 %v849_v4 }
 0x2e5   :  { %854 = vmatprep.subr.bf16.mxu1 %v853_v6 }
 0x2e7   :  { %856 = vmatpush3.bf16.msra.mxu1 %v853_v6 }
 0x2e8   :  { %858 = vmatprep.subr.bf16.mxu1 %v857_v9 }
 0x2eb   :  { %860 = vmatpush3.bf16.msra.mxu1 %v857_v9 }
 0x2ec   :  { %862 = vmatprep.subr.bf16.mxu1 %v861_v12 }
 0x2ef   :  { %864 = vmatpush3.bf16.msra.mxu1 %v861_v12 }
 0x3b5   :  { %v727_v51 = vpop.f32.mrb[0].mxu1 }
 0x3b6   :  { %v366_v52 = vadd.f32 %v727_v51, %v198_v49  ;;  %v360_v53 = vpop.f32.mrb[1].mxu1 }
 0x3b7   :  { %v361_v54 = vadd.f32 %v360_v53, %v197_v50 }
 0x3b8   :  { %v372_v55 = vsel %vm271_vm1, %v366_v52, -inf }
 0x3b9   :  { %373 = vmax.xlane.f32.xlu1 %v372_v55  ;;  %v369_v56 = vsel %vm271_vm1, %v361_v54, -inf }
 0x3ba   :  { %370 = vmax.xlane.f32.xlu0 %v369_v56 }
 0x446   :  { %v374_v57 = vpop.xlane.xlu1 %373 }
 0x447   :  { %v376_v58 = vsub.f32 %v366_v52, %v374_v57  ;;  %v371_v59 = vpop.xlane.xlu0 %370 }
 0x448   :  { %v375_v60 = vsub.f32 %v361_v54, %v371_v59 }
 0x449   :  { %v379_v61 = vmul.f32 1.442695, %v376_v58 }
 0x44a   :  { %v377_v62 = vmul.f32 1.442695, %v375_v60 }
 0x44c   :  { %899 = vpow2.f32 %v377_v62 }
 0x44d   :  { %901 = vpow2.f32 %v379_v61 }
 0x456   :  { %v900_v63 = vpop.eup %899 }
 0x457   :  { %v902_v0 = vpop.eup %901  ;;  %744 = vmatprep.mubr.msk.f32.mxu0 %vm271_vm1, %v900_v63 }
 0x458   :  { %745 = vmatmul.mubr.msk.f32.vlgmr.msra.gmra.mrb[4].mxu0 %vm271_vm1, %v902_v0 }
 0x459   :  { %836 = vmatpush3.bf16.msra.mxu0 %v833_v24  ;;  %763 = vmatprep.mubr.msk.f32.mxu0 %vm271_vm1, %v900_v63 }
 0x45a   :  { %838 = vmatprep.subr.bf16.mxu0 %v837_v25 }
 0x45d   :  { %840 = vmatpush3.bf16.msra.mxu0 %v837_v25 }
 0x45e   :  { %842 = vmatprep.subr.bf16.mxu0 %v1131_v26 }
 0x461   :  { %844 = vmatpush3.bf16.msra.mxu0 %v1131_v26 }
 0x462   :  { %846 = vmatprep.subr.bf16.mxu0 %v1133_v28 }
 0x465   :  { %848 = vmatpush3.bf16.msra.mxu0 %v1133_v28 }
 0x468   :  { %764 = vmatmul.mubr.msk.f32.vlgmr.msra.gmra.mrb[6].mxu0 %vm271_vm1, %v902_v0 }
 0x52b   :  { %v746_v13 = vpop.f32.mrb[4].mxu0 }
 0x52c   :  { %v453_v14 = vpop.f32.mrb[5].mxu0  ;;  %903 = vrcp.f32 %v746_v13 }
 0x52d   :  { %905 = vrcp.f32 %v453_v14 }
 0x536   :  { %v904_v15 = vpop.eup %903 }
 0x537   :  { %v906_v17 = vpop.eup %905 }
 0x53b   :  { %v765_v16 = vpop.f32.mrb[6].mxu0 }
 0x53c   :  { %v540_v18 = vmul.f32 %v904_v15, %v765_v16  ;;  %v528_v19 = vpop.f32.mrb[7].mxu0 }
 0x53d   :  { %v539_v20 = vmul.f32 %v906_v17, %v528_v19 }
 0x53f   :  { %782 = vmatprep.mubr.msk.f32.mxu1 %vm271_vm1, %v539_v20 }
 0x540   :  { %783 = vmatmul.mubr.msk.f32.vlgmr.msra.gmra.mrb[2].mxu1 %vm271_vm1, %v540_v18 }
 0x613   :  { %v784_v22 = vpop.f32.mrb[2].mxu1 }
 0x614   :  { %v628_v23 = vadd.f32 %v784_v22, %v549_v21  ;;  %v622_v24 = vpop.f32.mrb[3].mxu1 }
 0x615   :  { %v623_v25 = vadd.f32 %v622_v24, %v549_v21 }
 0x616   :  { %632 = vst.msk [vmem:[#allocation8 + $0x8] sm:$0xff] %vm58_vm0, %v628_v23 }
 0x617   :  { %631 = vst.msk [vmem:[#allocation8] sm:$0xff] %vm58_vm0, %v623_v25 }
 0x618   :  { %984 = shalt.err (!%p981_p0)
}
 0x619   :  { %s985_s28 = scalar_lea.hbm %s1194_s3, 256 }
 0x61a   :  { %p986_p1 = scmp.ne.s32.totalorder %s1194_s3, %s985_s28  ;;  %p989_p2 = scmp.lt.u32.totalorder %s985_s28, %s1194_s3 }
 0x61c   :  { %p991_p3 = pnand %p989_p2, %p986_p1 }
 0x61e   :  { %994 = shalt.err (!%p991_p3)
}
 0x61f   :  { %644 = dma.vmem_to_hbm [thread:$0]  %s639_s23, 256, %s1194_s3, [#allocation4], %s1005_s1, %s1005_s1, %s1006_s9  }
 0x620   :  { %999 = dma.done.wait [#allocation4], 256  }
 0x621   :  { %1000 = vsyncadd [#allocation4], 4294967040 }
 0x622   :  { %648 = vsyncpa [#allocation3], 1 }
 0x623   :  { %649 = vsyncpa [#allocation6], 1 }
 0x624   :  { %650 = vsyncpa [#allocation4], 1 }

</bundles_post_ra>
